<compile_context>
chip_gen: v7x
topology: tpu7x:2x2x1
jax: 0.10.0
libtpu: 0.0.40
codegen_flags: <defaults>
</compile_context>

<pallas_src>
import functools

import jax
import jax.numpy as jnp
import numpy as np
from jax import lax
from jax.experimental import pallas as pl
from jax.experimental.pallas import tpu as pltpu


# --------------------------------------------------------------------------- kernels


def _bond_embed_kernel_dmajor(*refs, offsets, v_total, te, prec):
    """Edges on lanes: out[:, tile] = table_T(D, V) @ multihot(V, TE)."""
    n = len(offsets)
    idx_refs, tab_ref, out_ref = refs[:n], refs[n], refs[n + 1]

    iota_v = lax.broadcasted_iota(jnp.int32, (v_total, te), 0)          # vocab on sublanes
    # Boolean OR over names (disjoint offset ranges), single cast afterwards.
    mask = (idx_refs[0][...] + offsets[0]) == iota_v                    # (1,TE) vs (V,TE)
    for i in range(1, n):
        mask = mask | ((idx_refs[i][...] + offsets[i]) == iota_v)
    mh = mask.astype(tab_ref.dtype)

    out_ref[...] = jnp.dot(
        tab_ref[...], mh,
        preferred_element_type=jnp.float32, precision=prec,
    ).astype(out_ref.dtype)


def _bond_embed_kernel_emajor(*refs, offsets, v_total, te, prec):
    """Edges on sublanes (embed_dim % 128 == 0): out[tile, :] = multihot(TE, V) @ table(V, D)."""
    n = len(offsets)
    idx_refs, tab_ref, out_ref = refs[:n], refs[n], refs[n + 1]

    iota_v = lax.broadcasted_iota(jnp.int32, (te, v_total), 1)          # vocab on lanes
    mask = (idx_refs[0][...] + offsets[0]) == iota_v                    # (TE,1) vs (TE,V)
    for i in range(1, n):
        mask = mask | ((idx_refs[i][...] + offsets[i]) == iota_v)
    mh = mask.astype(tab_ref.dtype)

    out_ref[...] = jnp.dot(
        mh, tab_ref[...],
        preferred_element_type=jnp.float32, precision=prec,
    ).astype(out_ref.dtype)


# --------------------------------------------------------------------------- wrapper


def prepare_bond_tables(tables, table_dtype=jnp.float32):
    """One-time parameter transform: fuse per-name tables along the vocab axis."""
    embed_dim = int(tables[0].shape[1])
    vpads = [pl.cdiv(int(t.shape[0]), 8) * 8 for t in tables]
    offsets = tuple(int(o) for o in np.concatenate([[0], np.cumsum(vpads[:-1])]))
    v_total = int(sum(vpads))
    tab_cat = jnp.concatenate(
        [jnp.pad(t.astype(table_dtype), ((0, vp - t.shape[0]), (0, 0)))
         for t, vp in zip(tables, vpads)],
        axis=0,
    )                                                                   # (V_total, D)
    return {
        "tab_vd": tab_cat,                 # (V_total, D)  for the edges-major kernel
        "tab_dv": tab_cat.T,               # (D, V_total)  for the dim-major kernel
        "offsets": offsets,
        "v_total": v_total,
        "embed_dim": embed_dim,
        "num_names": len(tables),
    }


def _choose_edge_tile(num_edges, embed_dim, v_total, num_names, requested, table_itemsize):
    """Edge tile: big (amortize ~0.35us/step), but keep >=4 grid steps and fit VMEM."""
    e128 = max(128, pl.cdiv(num_edges, 128) * 128)
    step_cap = max(128, (e128 // 4) // 128 * 128)       # >=4 steps (2 TCs on v7x x 2-buf)
    tile = max(128, min((requested // 128) * 128, step_cap, e128))

    def vmem_bytes(te):
        out_b = 2 * embed_dim * te * 4                  # double-buffered f32 output blocks
        idx_b = 2 * num_names * te * 4                  # double-buffered int32 index blocks
        tab_b = embed_dim * v_total * table_itemsize    # resident fused table
        mh_b = v_total * te * table_itemsize            # multi-hot temporary
        return out_b + idx_b + tab_b + mh_b

    budget = 20 * 1024 * 1024                           # headroom under the 32 MiB we request
    while tile > 128 and vmem_bytes(tile) > budget:
        tile = max(128, ((tile // 2) // 128) * 128)
    return tile


def _gather_fallback(edge_features, prepared):
    tab = prepared["tab_vd"].astype(jnp.float32)
    out = 0
    for f, off in zip(edge_features, prepared["offsets"]):
        out = out + jnp.take(tab, f.astype(jnp.int32) + off, axis=0)
    return out


def bond_embedding_pallas(edge_features, prepared, *, edge_tile=4096,
                          out_layout="edges_dim", use_pallas=None):
    """
    Args:
      edge_features: list of int arrays, each shape (num_edges,), one per bond name.
      prepared: output of prepare_bond_tables(tables) (hoisted parameter transform).
      edge_tile: requested edge tile (multiple of 128); auto-capped for grid/VMEM.
      out_layout: "edges_dim" -> (num_edges, embed_dim) like the PyTorch module;
                  "dim_edges" -> (embed_dim, num_edges), skipping the epilogue transpose.
      use_pallas: force True/False; None = auto (XLA gather below ~16k edges).
    """
    num_names = prepared["num_names"]
    embed_dim = prepared["embed_dim"]
    v_total = prepared["v_total"]
    offsets = prepared["offsets"]
    assert len(edge_features) == num_names
    num_edges = int(edge_features[0].shape[0])

    if use_pallas is None:
        use_pallas = num_edges >= 16384          # crossover vs XLA gather is O(10k) edges
    if not use_pallas:
        out = _gather_fallback(edge_features, prepared)
        return out.T if out_layout == "dim_edges" else out

    tab_dtype = prepared["tab_vd"].dtype
    itemsize = jnp.dtype(tab_dtype).itemsize
    edge_tile = _choose_edge_tile(num_edges, embed_dim, v_total, num_names,
                                  edge_tile, itemsize)
    grid = pl.cdiv(num_edges, edge_tile)
    e_pad = grid * edge_tile

    # Exact one-hot gather for f32 tables (full-f32 MXU passes); single bf16 pass otherwise.
    prec = lax.Precision.HIGHEST if tab_dtype == jnp.float32 else lax.Precision.DEFAULT

    edges_major = (out_layout == "edges_dim") and (embed_dim % 128 == 0)

    def prep_idx(f, shape):
        f = f.astype(jnp.int32)
        if e_pad != num_edges:                   # tiny 1D tail pad only (no stacked idx array)
            f = jnp.pad(f, (0, e_pad - num_edges))
        return f.reshape(shape)

    if edges_major:
        idx_arrs = [prep_idx(f, (e_pad, 1)) for f in edge_features]
        idx_specs = [pl.BlockSpec((edge_tile, 1), lambda e: (e, 0)) for _ in idx_arrs]
        tab = prepared["tab_vd"]                                        # (V_total, D)
        out_shape = jax.ShapeDtypeStruct((num_edges, embed_dim), jnp.float32)
        out_spec = pl.BlockSpec((edge_tile, embed_dim), lambda e: (e, 0))
        kernel = functools.partial(_bond_embed_kernel_emajor, offsets=offsets,
                                   v_total=v_total, te=edge_tile, prec=prec)
    else:
        idx_arrs = [prep_idx(f, (1, e_pad)) for f in edge_features]
        idx_specs = [pl.BlockSpec((1, edge_tile), lambda e: (0, e)) for _ in idx_arrs]
        tab = prepared["tab_dv"]                                        # (D, V_total)
        out_shape = jax.ShapeDtypeStruct((embed_dim, num_edges), jnp.float32)
        out_spec = pl.BlockSpec((embed_dim, edge_tile), lambda e: (0, e))
        kernel = functools.partial(_bond_embed_kernel_dmajor, offsets=offsets,
                                   v_total=v_total, te=edge_tile, prec=prec)

    out = pl.pallas_call(
        kernel,
        out_shape=out_shape,
        grid_spec=pltpu.PrefetchScalarGridSpec(
            num_scalar_prefetch=0,
            grid=(grid,),
            in_specs=idx_specs + [
                # fused table: whole array resident in VMEM (no per-step DMA / double-buffer)
                pl.BlockSpec(memory_space=pltpu.MemorySpace.VMEM),
            ],
            out_specs=out_spec,
        ),
        compiler_params=pltpu.CompilerParams(
            dimension_semantics=("parallel",),         # sharded across both TCs on v7x
            vmem_limit_bytes=32 * 1024 * 1024,         # v5e default-scoped is only 16 MiB
        ),
    )(*idx_arrs, tab)

    if edges_major or out_layout == "dim_edges":
        return out
    # embed_dim not a multiple of 128: emitting (TE, embed_dim) blocks would hit masked
    # vst.msk stores, so keep the lane-dense kernel layout and transpose once here.
    # Layout-aware callers should pass out_layout="dim_edges" to skip this entirely.
    return out.T


def bond_embedding_ref(edge_features, tables):
    """Pure-JAX reference matching the PyTorch forward."""
    out = 0
    for i, t in enumerate(tables):
        out = out + jnp.take(t.astype(jnp.float32),
                             edge_features[i].astype(jnp.int32), axis=0)
    return out


# --------------------------------------------------------------------------- demo


if __name__ == "__main__":
    # Synthetic CompoundKit bond feature sizes (feature_size + 5 = vocab).
    bond_names = ["bond_dir", "bond_type", "is_in_ring"]
    bond_feature_sizes = {"bond_dir": 7, "bond_type": 5, "is_in_ring": 2}

    key = jax.random.PRNGKey(0)

    def make_case(key, embed_dim, num_edges):
        tables, feats = [], []
        for name in bond_names:
            vocab = bond_feature_sizes[name] + 5
            key, k1, k2 = jax.random.split(key, 3)
            tables.append(jax.random.normal(k1, (vocab, embed_dim), jnp.float32))
            feats.append(jax.random.randint(k2, (num_edges,), 0, vocab, jnp.int32))
        return key, tables, feats

    # Case 1: module-like tiny config (embed_dim=32 -> dim-major kernel + one transpose).
    key, tables, feats = make_case(key, 32, 50)
    prep = prepare_bond_tables(tables)                    # hoisted parameter transform
    out = jax.block_until_ready(bond_embedding_pallas(feats, prep, use_pallas=True))
    ref = bond_embedding_ref(feats, tables)
    np.testing.assert_allclose(np.asarray(out), np.asarray(ref), rtol=1e-5, atol=1e-5)

    # Case 2: embed_dim=128 -> edges-major kernel, lane-dense output, NO epilogue transpose.
    key, tables2, feats2 = make_case(key, 128, 300)
    prep2 = prepare_bond_tables(tables2)
    out2 = jax.block_until_ready(bond_embedding_pallas(feats2, prep2, use_pallas=True))
    ref2 = bond_embedding_ref(feats2, tables2)
    np.testing.assert_allclose(np.asarray(out2), np.asarray(ref2), rtol=1e-5, atol=1e-5)

    # Case 3: optional bf16 table path (single-pass MXU); table rounding -> looser tolerance.
    prep3 = prepare_bond_tables(tables2, table_dtype=jnp.bfloat16)
    out3 = jax.block_until_ready(bond_embedding_pallas(feats2, prep3, use_pallas=True))
    np.testing.assert_allclose(np.asarray(out3), np.asarray(ref2), rtol=2e-2, atol=2e-2)

    # TODO(synk): nn.Embedding raises on out-of-range indices; here OOB/negative indices are
    # silently absorbed by the multi-hot (documented assumption: inputs are in-range).
    print("KERNEL_OK")
</pallas_src>

<mosaic_0001>
module attributes {stable_mosaic.version = 11 : i64} {
  func.func @_bond_embed_kernel_dmajor(%arg0: i32, %arg1: memref<1x128xi32, #tpu.memory_space<vmem>>, %arg2: memref<1x128xi32, #tpu.memory_space<vmem>>, %arg3: memref<1x128xi32, #tpu.memory_space<vmem>>, %arg4: memref<32x40xf32, #tpu.memory_space<vmem>>, %arg5: memref<32x128xf32, #tpu.memory_space<vmem>>) attributes {dimension_semantics = [#tpu.dimension_semantics<parallel>], iteration_bounds = array<i64: 1>, scalar_prefetch = 0 : i64, scratch_operands = 0 : i64, tpu.core_type = #tpu.core_type<tc>, window_params = [{transform_indices = @transform_0, window_bounds = array<i64: 1, 128>}, {transform_indices = @transform_1, window_bounds = array<i64: 1, 128>}, {transform_indices = @transform_2, window_bounds = array<i64: 1, 128>}, {pipeline_mode = #tpu.pipeline_mode<synchronous>, transform_indices = @transform_3, window_bounds = array<i64: 32, 40>}, {transform_indices = @transform_4, window_bounds = array<i64: 32, 128>}]} {
    %0 = tpu.iota {dimensions = array<i32: 0>} : vector<40x128xi32>
    %c0 = arith.constant 0 : index
    %c0_0 = arith.constant 0 : index
    %1 = vector.load %arg1[%c0, %c0_0] : memref<1x128xi32, #tpu.memory_space<vmem>>, vector<1x128xi32>
    %c0_i32 = arith.constant 0 : i32
    %2 = vector.broadcast %c0_i32 : i32 to vector<1x128xi32>
    %3 = arith.addi %1, %2 : vector<1x128xi32>
    %4 = vector.broadcast %3 : vector<1x128xi32> to vector<40x128xi32>
    %5 = arith.cmpi eq, %4, %0 : vector<40x128xi32>
    %c0_1 = arith.constant 0 : index
    %c0_2 = arith.constant 0 : index
    %6 = vector.load %arg2[%c0_1, %c0_2] : memref<1x128xi32, #tpu.memory_space<vmem>>, vector<1x128xi32>
    %c16_i32 = arith.constant 16 : i32
    %7 = vector.broadcast %c16_i32 : i32 to vector<1x128xi32>
    %8 = arith.addi %6, %7 : vector<1x128xi32>
    %9 = vector.broadcast %8 : vector<1x128xi32> to vector<40x128xi32>
    %10 = arith.cmpi eq, %9, %0 : vector<40x128xi32>
    %11 = arith.ori %5, %10 : vector<40x128xi1>
    %c0_3 = arith.constant 0 : index
    %c0_4 = arith.constant 0 : index
    %12 = vector.load %arg3[%c0_3, %c0_4] : memref<1x128xi32, #tpu.memory_space<vmem>>, vector<1x128xi32>
    %c32_i32 = arith.constant 32 : i32
    %13 = vector.broadcast %c32_i32 : i32 to vector<1x128xi32>
    %14 = arith.addi %12, %13 : vector<1x128xi32>
    %15 = vector.broadcast %14 : vector<1x128xi32> to vector<40x128xi32>
    %16 = arith.cmpi eq, %15, %0 : vector<40x128xi32>
    %17 = arith.ori %11, %16 : vector<40x128xi1>
    %18 = arith.extui %17 : vector<40x128xi1> to vector<40x128xi32>
    %19 = arith.sitofp %18 : vector<40x128xi32> to vector<40x128xf32>
    %c0_5 = arith.constant 0 : index
    %c0_6 = arith.constant 0 : index
    %20 = vector.load %arg4[%c0_5, %c0_6] : memref<32x40xf32, #tpu.memory_space<vmem>>, vector<32x40xf32>
    %cst = arith.constant dense<0.000000e+00> : vector<32x128xf32>
    %21 = tpu.matmul %20, %19, %cst {dimension_numbers = #tpu.dot_dimension_numbers<[1], [0], [0], [1], [0, 0, 1, 1], [], []>, precision = #tpu.contract_precision<fp32>} : vector<32x40xf32>, vector<40x128xf32>, vector<32x128xf32> -> vector<32x128xf32>
    %c0_7 = arith.constant 0 : index
    %c0_8 = arith.constant 0 : index
    %22 = vector.load %arg5[%c0_7, %c0_8] : memref<32x128xf32, #tpu.memory_space<vmem>>, vector<32x128xf32>
    tpu.vector_store %arg5[%c0_7, %c0_8], %21 {strides = array<i32>} : memref<32x128xf32, #tpu.memory_space<vmem>>, vector<32x128xf32>,
    return
  }
  func.func @transform_0(%arg0: i32) -> (i32, i32) {
    %c0_i32 = arith.constant 0 : i32
    %c0_i32_0 = arith.constant 0 : i32
    return %c0_i32, %arg0 : i32, i32
  }
  func.func @transform_1(%arg0: i32) -> (i32, i32) {
    %c0_i32 = arith.constant 0 : i32
    %c0_i32_0 = arith.constant 0 : i32
    return %c0_i32, %arg0 : i32, i32
  }
  func.func @transform_2(%arg0: i32) -> (i32, i32) {
    %c0_i32 = arith.constant 0 : i32
    %c0_i32_0 = arith.constant 0 : i32
    return %c0_i32, %arg0 : i32, i32
  }
  func.func @transform_3(%arg0: i32) -> (i32, i32) {
    %c0_i32 = arith.constant 0 : i32
    %c0_i32_0 = arith.constant 0 : i32
    %c0_i32_1 = arith.constant 0 : i32
    return %c0_i32, %c0_i32_0 : i32, i32
  }
  func.func @transform_4(%arg0: i32) -> (i32, i32) {
    %c0_i32 = arith.constant 0 : i32
    %c0_i32_0 = arith.constant 0 : i32
    return %c0_i32, %arg0 : i32, i32
  }
}

</mosaic_0001>

<bundles_post_ra>
// kernel: tpu_custom_call.1
= control target key start
LH: loop header
LB: loop body
LE: loop exit
PB: predicated region body
PF: predicated region fallthrough
CT: control target
= control target key end

     0   :  { %9 = vsyncpa [#allocation3], 0  ;;  %s1346_s0 = inlined_call_operand.hbm [shape: s32[1,128], index: 0, kind: input, shape index: {}]   ;;  %s1347_s1 = inlined_call_operand.vmem [shape: s32[1,128], index: 1, kind: input, shape index: {}]   ;;  %s1348_s2 = inlined_call_operand.vmem [shape: s32[1,128], index: 2, kind: input, shape index: {}]   ;;  %s1349_s3 = inlined_call_operand.hbm [shape: f32[32,40], index: 3, kind: input, shape index: {}]   ;;  %s1350_s4 = inlined_call_operand.hbm [shape: f32[32,50], index: 4, kind: output, shape index: {}]  }
   0x1   :  { %10 = vsyncpa [#allocation6], 0 }
   0x2   :  { %11 = vsyncpa [#allocation4], 0  ;;  %s1087_s15 = smov [#allocation2]   ;;  %s1088_s17 = smov [#allocation5]  }
   0x3   :  { %s18_s16 = sshll.u32 %s1087_s15, 4  ;;  %s31_s18 = sshll.u32 %s1088_s17, 4  ;;  %s19_s16 = int_to_ptr.vmem [resolvable:$true] %s18_s16  ;;  %s1120_s18 = int_to_ptr.vmem [resolvable:$true] %s31_s18 }
   0x4   :  { %s1015_s21 = scalar_lea.hbm %s1346_s0, 16 }
   0x5   :  { %p1016_p0 = scmp.ne.s32.totalorder %s1346_s0, %s1015_s21  ;;  %p1019_p1 = scmp.lt.u32.totalorder %s1015_s21, %s1346_s0 }
   0x7   :  { %p1021_p2 = pnand %p1019_p1, %p1016_p0 }
   0x9   :  { %1024 = shalt.err (!%p1021_p2)
}
   0xa   :  { %s1025_s26 = scalar_lea.vmem %s19_s16, 16  ;;  %s1029_s27 = scalar_lea.vmem %s19_s16, 32 }
   0xb   :  { %p1026_p3 = scmp.ne.s32.totalorder %s19_s16, %s1025_s26  ;;  %p1030_p4 = scmp.lt.s32.totalorder %s19_s16, %s19_s16 }
   0xc   :  { %p1031_p5 = scmp.lt.s32.totalorder %s1029_s27, %s1025_s26 }
   0xe   :  { %p1032_p6 = por %p1031_p5, %p1030_p4 }
  0x10   :  { %p1033_p7 = pnand %p1032_p6, %p1026_p3 }
  0x12   :  { %1036 = shalt.err (!%p1033_p7)
}
  0x13   :  { %21 = dma.hbm_to_vmem [thread:$0]  %s1346_s0, 16, %s19_s16, [#allocation3]  }
  0x14   :  { %s1037_s6 = scalar_lea.hbm %s1349_s3, 512 }
  0x15   :  { %p1038_p8 = scmp.ne.s32.totalorder %s1349_s3, %s1037_s6  ;;  %p1041_p9 = scmp.lt.u32.totalorder %s1037_s6, %s1349_s3 }
  0x17   :  { %p1043_p10 = pnand %p1041_p9, %p1038_p8 }
  0x19   :  { %1046 = shalt.err (!%p1043_p10)
}
  0x1a   :  { %s1047_s11 = scalar_lea.vmem %s1120_s18, 512  ;;  %p1052_p12 = scmp.lt.s32.totalorder %s1120_s18, %s1120_s18 }
  0x1b   :  { %p1048_p11 = scmp.ne.s32.totalorder %s1120_s18, %s1047_s11  ;;  %p1053_p13 = scmp.lt.s32.totalorder %s1047_s11, %s1047_s11 }
  0x1d   :  { %p1054_p0 = por %p1053_p13, %p1052_p12 }
  0x1f   :  { %p1055_p1 = pnand %p1054_p0, %p1048_p11 }
  0x21   :  { %1058 = shalt.err (!%p1055_p1)
}
  0x22   :  { %s1089_s0 = smov 128   ;;  %s1090_s12 = smov 8  }
  0x23   :  { %37 = dma.hbm_to_vmem [thread:$0]  %s1349_s3, 512, %s1120_s18, [#allocation6], %s1089_s0, %s1089_s0, %s1090_s12  }
  0x24   :  { %1081 = dma.done.wait [#allocation3], 16  }
  0x25   :  { %1082 = vsyncadd [#allocation3], 4294967280 }
  0x26   :  { %1083 = dma.done.wait [#allocation6], 512  }
  0x27   :  { %1084 = vsyncadd [#allocation6], 4294966784  ;;  %v44_v0 = vlaneseq  ;;  %vm106_vm0 = vcmask 326656   ;;  %v1154_v4 = vld [vmem:[#allocation2] ss:$0 sm:$0xff]  ;;  %v102_v9 = vld [vmem:[#allocation5] sm:$0xff] }
  0x28   :  { %v60_v5 = vld [vmem:[%s1347_s1] sm:$0x1]  ;;  %v103_v10 = vld [vmem:[#allocation5 + $0x8] sm:$0xff]  ;;  %v104_v11 = vld [vmem:[#allocation5 + $0x10] sm:$0xff]  ;;  %v108_v14 = vsel %vm106_vm0, %v102_v9, 0  ;;  %v1091_v28 = vmov 0.0  }
  0x29   :  { %v45_v1 = vshrl.u32 %v44_v0, 7  ;;  %v76_v6 = vld [vmem:[%s1348_s2] sm:$0x1]  ;;  %v61_v7 = vadd.s32 16, %v60_v5  ;;  %v1168_v18 = vand.u32 4294901760, %v108_v14  ;;  %v111_v19 = vsel %vm106_vm0, %v103_v10, 0 }
  0x2a   :  { %v77_v8 = vadd.s32 32, %v76_v6  ;;  %v105_v15 = vld [vmem:[#allocation5 + $0x18] sm:$0xff]  ;;  %v1172_v20 = vand.u32 4294901760, %v111_v19  ;;  %v114_v21 = vsel %vm106_vm0, %v104_v11, 0  ;;  %v1092_v36 = vmov 1.0|1.0  }
  0x2b   :  { %v46_v2 = vadd.s32 8, %v45_v1  ;;  %v64_v3 = vsub.s32 0, %v45_v1  ;;  %vm55_vm1 = vcmp.eq.s32.totalorder %v1154_v4, %v45_v1  ;;  %v47_v12 = vadd.s32 16, %v45_v1  ;;  %s1094_s1 = smov [#allocation7]  }
  0x2c   :  { %v48_v13 = vadd.s32 24, %v45_v1  ;;  %v117_v22 = vsel %vm106_vm0, %v105_v15, 0  ;;  %v49_v23 = vadd.s32 32, %v45_v1  ;;  %v1185_v24 = vsub.f32 %v108_v14, %v1168_v18  ;;  %s755_s2 = sshll.u32 %s1094_s1, 4  ;;  %s756_s2 = int_to_ptr.vmem [resolvable:$true] %s755_s2 }
  0x2d   :  { %v1164_v16 = vrot.slane %v61_v7, %v64_v3  ;;  %v1166_v17 = vrot.slane %v77_v8, %v64_v3  ;;  %vm56_vm2 = vcmp.eq.s32.totalorder %v1154_v4, %v46_v2  ;;  %vm57_vm9 = vcmp.eq.s32.totalorder %v1154_v4, %v47_v12  ;;  %s1059_s3 = scalar_lea.vmem %s756_s2, 512  ;;  %p1064_p3 = scmp.lt.s32.totalorder %s756_s2, %s756_s2 }
  0x2e   :  { %vm58_vm10 = vcmp.eq.s32.totalorder %v1154_v4, %v48_v13  ;;  %v1188_v25 = vsub.f32 %v111_v19, %v1172_v20  ;;  %v1192_v26 = vand.u32 4294901760, %v114_v21  ;;  %v1194_v27 = vand.u32 4294901760, %v117_v22  ;;  %p1060_p2 = scmp.ne.s32.totalorder %s756_s2, %s1059_s3  ;;  %p1065_p4 = scmp.lt.s32.totalorder %s1059_s3, %s1059_s3 }
  0x2f   :  { %vm66_vm3 = vcmp.eq.s32.totalorder %v1164_v16, %v45_v1  ;;  %vm67_vm4 = vcmp.eq.s32.totalorder %v1164_v16, %v46_v2  ;;  %vm82_vm5 = vcmp.eq.s32.totalorder %v1166_v17, %v45_v1  ;;  %vm83_vm7 = vcmp.eq.s32.totalorder %v1166_v17, %v46_v2 }
  0x30   :  { %vm71_vm6 = vmor %vm55_vm1, %vm66_vm3  ;;  %vm68_vm12 = vcmp.eq.s32.totalorder %v1164_v16, %v47_v12  ;;  %vm69_vm13 = vcmp.eq.s32.totalorder %v1164_v16, %v48_v13  ;;  %vm84_vm15 = vcmp.eq.s32.totalorder %v1166_v17, %v47_v12  ;;  %vm85_vm0 = vcmp.eq.s32.totalorder %v1166_v17, %v48_v13  ;;  %p1066_p5 = por %p1065_p4, %p1064_p3 }
  0x31   :  { %vm72_vm8 = vmor %vm56_vm2, %vm67_vm4  ;;  %v191_v30 = vand.u32 4294901760, %v1185_v24  ;;  %v201_v34 = vand.u32 4294901760, %v1188_v25  ;;  %v1207_v35 = vsub.f32 %v114_v21, %v1192_v26  ;;  %v1223_v39 = vsub.f32 %v117_v22, %v1194_v27 }
  0x32   :  { %vm87_vm11 = vmor %vm71_vm6, %vm82_vm5  ;;  %vm59_vm4 = vcmp.eq.s32.totalorder %v1154_v4, %v49_v23  ;;  %vm70_vm6 = vcmp.eq.s32.totalorder %v1164_v16, %v49_v23  ;;  %v1093_v58 = vmov 1.0   ;;  %p1067_p6 = pnand %p1066_p5, %p1060_p2 }
  0x33   :  { %vm88_vm14 = vmor %vm72_vm8, %vm83_vm7  ;;  %v769_v29 = vsel %vm87_vm11, 1.0, %v1091_v28  ;;  %v192_v38 = vsub.f32 %v1185_v24, %v191_v30  ;;  %901 = vmatprep.mubr.f32.mxu0 %v191_v30  ;;  %v211_v43 = vand.u32 4294901760, %v1207_v35  ;;  %vm86_vm8 = vcmp.eq.s32.totalorder %v1166_v17, %v49_v23 }
  0x34   :  { %v770_v31 = vsel %vm88_vm14, 1.0, %v1091_v28  ;;  %vm1199_vm1 = vmpackc.low %vm88_vm14, %vm87_vm11  ;;  %v1203_v33 = vsub.f32 %v769_v29, %v769_v29  ;;  %v202_v46 = vsub.f32 %v1188_v25, %v201_v34  ;;  %v221_v51 = vand.u32 4294901760, %v1223_v39 }
  0x35   :  { %940 = vmatprep.subr.msk.bf16.mxu1 %vm1199_vm1, %v1092_v36  ;;  %v1212_v37 = vsub.f32 %v770_v31, %v770_v31  ;;  %964 = vmatprep.subr.msk.bf16.mxu0 %vm1199_vm1, %v1092_v36  ;;  %vm73_vm2 = vmor %vm57_vm9, %vm68_vm12  ;;  %v193_v41 = vand.u32 4294901760, %v192_v38  ;;  %v212_v57 = vsub.f32 %v1207_v35, %v211_v43 }
  0x36   :  { %942 = vmatpush3.bf16.msk.msra.mxu1 %vm1199_vm1, %v1092_v36  ;;  %966 = vmatpush3.bf16.msk.msra.mxu0 %vm1199_vm1, %v1092_v36  ;;  %vm74_vm3 = vmor %vm58_vm10, %vm69_vm13  ;;  %v232_v40 = vand.u32 4294901760, %v1203_v33  ;;  %v203_v60 = vand.u32 4294901760, %v202_v46  ;;  %v222_v1 = vsub.f32 %v1223_v39, %v221_v51 }
  0x37   :  { %vm89_vm5 = vmor %vm73_vm2, %vm84_vm15  ;;  %v239_v42 = vand.u32 4294901760, %v1212_v37  ;;  %853 = vmatprep.mubr.f32.mxu1 %v193_v41  ;;  %v213_v6 = vand.u32 4294901760, %v212_v57  ;;  %v955_v13 = vpack.c.bf16 %v1212_v37, %v1203_v33 }
  0x38   :  { %vm90_vm7 = vmor %vm74_vm3, %vm85_vm0  ;;  %v771_v44 = vsel %vm89_vm5, 1.0, %v1091_v28  ;;  %v233_v45 = vsub.f32 %v1203_v33, %v232_v40  ;;  %v223_v9 = vand.u32 4294901760, %v222_v1 }
  0x39   :  { %v772_v47 = vsel %vm90_vm7, 1.0, %v1091_v28  ;;  %vm1249_vm9 = vmpackc.low %vm90_vm7, %vm89_vm5  ;;  %v245_v49 = vsub.f32 %v771_v44, %v771_v44  ;;  %v240_v50 = vsub.f32 %v1212_v37, %v239_v42  ;;  %v971_v59 = vpack.c.bf16 %v239_v42, %v232_v40 }
  0x3a   :  { %944 = vmatprep.subr.msk.bf16.mxu1 %vm1249_vm9, %v1092_v36  ;;  %v252_v52 = vsub.f32 %v772_v47, %v772_v47  ;;  %968 = vmatprep.subr.msk.bf16.mxu0 %vm1249_vm9, %v1092_v36  ;;  %vm75_vm10 = vmor %vm59_vm4, %vm70_vm6  ;;  %v234_v53 = vand.u32 4294901760, %v233_v45 }
  0x3b   :  { %946 = vmatpush3.bf16.msk.msra.mxu1 %vm1249_vm9, %v1092_v36  ;;  %970 = vmatpush3.bf16.msk.msra.mxu0 %vm1249_vm9, %v1092_v36  ;;  %vm1273_vm11 = vmor %vm75_vm10, %vm86_vm8  ;;  %v241_v55 = vand.u32 4294901760, %v240_v50  ;;  %v246_v56 = vand.u32 4294901760, %v245_v49 }
  0x3c   :  { %851 = vmatprep.subr.msk.mxu1 %vm1273_vm11, %v1093_v58  ;;  %899 = vmatprep.subr.msk.mxu0 %vm1273_vm11, %v1093_v58  ;;  %v253_v61 = vand.u32 4294901760, %v252_v52  ;;  %v773_v62 = vsel %vm1273_vm11, 1.0, %v1091_v28  ;;  %v959_v14 = vpack.c.bf16 %v252_v52, %v245_v49 }
  0x3d   :  { %v947_v63 = vpack.c.bf16 %v241_v55, %v234_v53  ;;  %v247_v0 = vsub.f32 %v245_v49, %v246_v56  ;;  %v259_v2 = vsub.f32 %v773_v62, %v773_v62 }
  0x3e   :  { %v254_v3 = vsub.f32 %v252_v52, %v253_v61  ;;  %v975_v5 = vpack.c.bf16 %v253_v61, %v246_v56 }
  0x3f   :  { %852 = vmatpush3.msk.msra.mxu1 %vm1273_vm11, %v1093_v58  ;;  %900 = vmatpush3.msk.msra.mxu0 %vm1273_vm11, %v1093_v58  ;;  %v248_v4 = vand.u32 4294901760, %v247_v0  ;;  %v260_v7 = vand.u32 4294901760, %v259_v2 }
  0x40   :  { %948 = vmatprep.subr.bf16.mxu1 %v947_v63  ;;  %972 = vmatprep.subr.bf16.mxu0 %v971_v59  ;;  %v255_v8 = vand.u32 4294901760, %v254_v3 }
  0x41   :  { %854 = vmatmul.mubr.f32.vlgmr.msra.gmra.mrb[0].mxu1 %v203_v60  ;;  %902 = vmatmul.mubr.f32.vlgmr.msra.gmra.mrb[0].mxu0 %v201_v34  ;;  %v261_v10 = vsub.f32 %v259_v2, %v260_v7 }
  0x42   :  { %950 = vmatpush3.bf16.msra.mxu1 %v947_v63  ;;  %974 = vmatpush3.bf16.msra.mxu0 %v971_v59  ;;  %v951_v11 = vpack.c.bf16 %v255_v8, %v248_v4 }
  0x43   :  { %976 = vmatprep.subr.bf16.mxu0 %v975_v5  ;;  %856 = vmatprep.mubr.f32.mxu1 %v213_v6  ;;  %v262_v12 = vand.u32 4294901760, %v261_v10 }
  0x44   :  { %952 = vmatprep.subr.bf16.mxu1 %v951_v11  ;;  %904 = vmatprep.mubr.f32.mxu0 %v211_v43 }
  0x45   :  { %857 = vmatmul.mubr.f32.gmra.mrb[2].mxu1 %v223_v9  ;;  %905 = vmatmul.mubr.f32.gmra.mrb[2].mxu0 %v221_v51 }
  0x46   :  { %954 = vmatpush3.bf16.msra.mxu1 %v951_v11  ;;  %978 = vmatpush3.bf16.msra.mxu0 %v975_v5 }
  0x47   :  { %867 = vmatprep.subr.mxu1 %v262_v12  ;;  %915 = vmatprep.subr.mxu0 %v260_v7 }
  0x48   :  { %869 = vmatprep.mubr.f32.mxu1 %v1168_v18  ;;  %917 = vmatprep.mubr.f32.mxu0 %v1168_v18 }
  0x4a   :  { %868 = vmatpush3.msra.mxu1 %v262_v12  ;;  %916 = vmatpush3.msra.mxu0 %v260_v7 }
  0x4b   :  { %956 = vmatprep.subr.bf16.mxu1 %v955_v13  ;;  %980 = vmatprep.subr.msk.bf16.mxu0 %vm1199_vm1, %v1092_v36 }
  0x4c   :  { %870 = vmatmul.mubr.f32.vlgmr.msra.gmra.mrb[0].mxu1 %v1172_v20  ;;  %918 = vmatmul.mubr.f32.vlgmr.msra.gmra.mrb[0].mxu0 %v1172_v20 }
  0x4d   :  { %958 = vmatpush3.bf16.msra.mxu1 %v955_v13  ;;  %982 = vmatpush3.bf16.msk.msra.mxu0 %vm1199_vm1, %v1092_v36 }
  0x4e   :  { %960 = vmatprep.subr.bf16.mxu1 %v959_v14  ;;  %984 = vmatprep.subr.msk.bf16.mxu0 %vm1249_vm9, %v1092_v36 }
  0x4f   :  { %872 = vmatprep.mubr.f32.mxu1 %v1192_v26  ;;  %920 = vmatprep.mubr.f32.mxu0 %v1192_v26 }
  0x50   :  { %873 = vmatmul.mubr.f32.gmra.mrb[2].mxu1 %v1194_v27  ;;  %921 = vmatmul.mubr.f32.gmra.mrb[2].mxu0 %v1194_v27 }
  0x51   :  { %962 = vmatpush3.bf16.msra.mxu1 %v959_v14  ;;  %986 = vmatpush3.bf16.msk.msra.mxu0 %vm1249_vm9, %v1092_v36 }
  0x52   :  { %883 = vmatprep.subr.mxu1 %v259_v2  ;;  %931 = vmatprep.subr.msk.mxu0 %vm1273_vm11, %v1093_v58 }
  0x53   :  { %885 = vmatprep.mubr.f32.mxu1 %v1185_v24  ;;  %933 = vmatprep.mubr.f32.mxu0 %v1168_v18 }
  0x55   :  { %884 = vmatpush3.msra.mxu1 %v259_v2  ;;  %932 = vmatpush3.msk.msra.mxu0 %vm1273_vm11, %v1093_v58 }
  0x56   :  { %886 = vmatmul.mubr.f32.vlgmr.msra.gmra.mrb[0].mxu1 %v1188_v25  ;;  %934 = vmatmul.mubr.f32.vlgmr.msra.gmra.mrb[0].mxu0 %v1172_v20 }
  0x57   :  { %888 = vmatprep.mubr.f32.mxu1 %v1207_v35  ;;  %936 = vmatprep.mubr.f32.mxu0 %v1192_v26 }
  0x5a   :  { %889 = vmatmul.mubr.f32.gmra.mrb[2].mxu1 %v1223_v39  ;;  %937 = vmatmul.mubr.f32.gmra.mrb[2].mxu0 %v1194_v27 }
 0x129   :  { %v887_v15 = vpop.f32.mrb[0].mxu1  ;;  %v935_v16 = vpop.f32.mrb[0].mxu0 }
 0x12a   :  { %v987_v17 = vadd.f32 %v935_v16, %v887_v15  ;;  %v421_v18 = vpop.f32.mrb[1].mxu1  ;;  %v724_v19 = vpop.f32.mrb[1].mxu0 }
 0x12b   :  { %v988_v21 = vadd.f32 %v724_v19, %v421_v18 }
 0x12c   :  { %747 = vst [vmem:[#allocation7 + $0x8] sm:$0xff] %v987_v17 }
 0x12d   :  { %746 = vst [vmem:[#allocation7] sm:$0xff] %v988_v21  ;;  %v890_v22 = vpop.f32.mrb[2].mxu1  ;;  %v938_v20 = vpop.f32.mrb[2].mxu0 }
 0x12e   :  { %v989_v23 = vadd.f32 %v938_v20, %v890_v22  ;;  %v435_v24 = vpop.f32.mrb[3].mxu1  ;;  %v736_v25 = vpop.f32.mrb[3].mxu0 }
 0x12f   :  { %v990_v26 = vadd.f32 %v736_v25, %v435_v24 }
 0x130   :  { %749 = vst [vmem:[#allocation7 + $0x18] sm:$0xff] %v989_v23 }
 0x131   :  { %748 = vst [vmem:[#allocation7 + $0x10] sm:$0xff] %v990_v26 }
 0x132   :  { %1070 = shalt.err (!%p1067_p6)
}
 0x133   :  { %s1071_s21 = scalar_lea.hbm %s1350_s4, 512 }
 0x134   :  { %p1072_p7 = scmp.ne.s32.totalorder %s1350_s4, %s1071_s21  ;;  %p1075_p8 = scmp.lt.u32.totalorder %s1071_s21, %s1350_s4 }
 0x136   :  { %p1077_p9 = pnand %p1075_p8, %p1072_p7 }
 0x138   :  { %1080 = shalt.err (!%p1077_p9)
}
 0x139   :  { %761 = dma.vmem_to_hbm [thread:$0]  %s756_s2, 512, %s1350_s4, [#allocation4], %s1089_s0, %s1089_s0, %s1090_s12  }
 0x13a   :  { %1085 = dma.done.wait [#allocation4], 512  }
 0x13b   :  { %1086 = vsyncadd [#allocation4], 4294966784 }
 0x13c   :  { %765 = vsyncpa [#allocation3], 1 }
 0x13d   :  { %766 = vsyncpa [#allocation6], 1 }
 0x13e   :  { %767 = vsyncpa [#allocation4], 1 }

</bundles_post_ra>
